<compile_context>
chip_gen: v5e
topology: v5e:2x2
jax: 0.10.0
libtpu: 0.0.40
codegen_flags: <defaults>
</compile_context>

<pallas_src>
import functools
import math

import jax
import jax.numpy as jnp
from jax.experimental import pallas as pl
from jax.experimental.pallas import tpu as pltpu


def data_embedding_kernel(x_ref, w_ref, pos_ref, off_ref, freq_ref, sel_ref, o_ref,
                          *, seq_len):
    """One row-tile of the fused 1x1-conv matmul + positional-embedding add.

    x_ref:    (TILE_P, K)  packed rows (r original time rows per packed row)
    w_ref:    (K, N)       block-diagonal Conv1d(k=1) weight (r copies of W.T)
    pos_ref:  (TILE_P, 1)  f32 base time index of each packed row
    off_ref:  (1, N)       f32 per-lane row offset (j // d_model)
    freq_ref: (1, N)       f32 per-lane inverse frequency
    sel_ref:  (1, N)       f32 per-lane parity: 0 -> sin, 1 -> cos
    o_ref:    (TILE_P, N)  f32 output (lane-dense)
    """
    # Token embedding on the MXU, f32 accumulation.
    y = jnp.dot(x_ref[...], w_ref[...], preferred_element_type=jnp.float32)

    # Positional embedding computed in-kernel (EUP exp/sin/cos are otherwise idle
    # in this HBM-bound kernel; saves streaming an (L, d_model) table from HBM).
    # pe[:, 2k]   = sin(pos * exp(-2k * ln(1e4)/d_model))
    # pe[:, 2k+1] = cos(pos * exp(-2k * ln(1e4)/d_model))
    pos = pos_ref[...] + off_ref[...]                      # (TILE_P,1)+(1,N) -> (TILE_P,N)
    pos = pos - seq_len * jnp.floor(pos / seq_len)         # wrap across the L boundary
    angle = pos * freq_ref[...]
    pe = jnp.where(sel_ref[...] == 0.0, jnp.sin(angle), jnp.cos(angle))

    o_ref[...] = (y + pe).astype(o_ref.dtype)


def data_embedding(x, w, *, tile_m=1024, compute_dtype=jnp.float32):
    """x: (B, L, c_in); w: (c_in, d_model) (already transposed). Returns (B, L, d_model) f32."""
    B, L, c_in = x.shape
    d_model = w.shape[1]
    M = B * L

    # Lane-packing factor: fold r consecutive time rows into the lane dimension so
    # the output tile's last dim is a multiple of 128 (unmasked stores, dense DMA).
    if d_model < 128 and 128 % d_model == 0:
        r = 128 // d_model
    else:
        r = 1
    K, N = r * c_in, r * d_model
    row_quant = 8 * r                       # packed sublane quantum in original rows

    # Row-tile selection: >=512 rows reaches ~85% of the HBM roofline; cap so the
    # double-buffered (x + out) tiles plus W stay well inside scoped VMEM everywhere.
    bytes_per_row = 4 * (c_in + d_model) + 8
    vmem_budget = 24 << 20
    cap = max(row_quant, (vmem_budget // (4 * bytes_per_row)) // row_quant * row_quant)
    TILE_M = max(row_quant, min(tile_m, cap) // row_quant * row_quant)
    if M < TILE_M:
        TILE_M = -(-M // row_quant) * row_quant
    M_pad = -(-M // TILE_M) * TILE_M
    num_tiles = M_pad // TILE_M
    TILE_P = TILE_M // r
    P = M_pad // r

    # Flattened + padded inputs (pad rows are garbage and sliced off at the end),
    # then the free row-major reshape into the lane-packed layout.
    x2 = x.reshape(M, c_in)
    if M_pad != M:
        x2 = jnp.pad(x2, ((0, M_pad - M), (0, 0)))
    x_packed = x2.reshape(P, K)

    # Per-packed-row base position (exact small ints in f32) + per-lane tables.
    pos_base = ((jnp.arange(P, dtype=jnp.int32) * r) % L).astype(jnp.float32)[:, None]
    j = jnp.arange(N, dtype=jnp.int32)
    col = j % d_model
    off_lane = (j // d_model).astype(jnp.float32)[None, :]                    # (1, N)
    freq_lane = jnp.exp(((col // 2) * 2).astype(jnp.float32)
                        * (-math.log(10000.0) / d_model))[None, :]            # (1, N)
    sel_lane = (col % 2).astype(jnp.float32)[None, :]                         # (1, N)

    # Block-diagonal weight: y_packed = x_packed @ kron(I_r, W).
    w_block = w if r == 1 else jnp.kron(jnp.eye(r, dtype=w.dtype), w)         # (K, N)

    if compute_dtype != jnp.float32:
        # Optional bf16 inputs for v6e/v7x: halves x/W HBM traffic; matmul still
        # accumulates in f32 and the pe add stays f32 (v5e-safe).
        x_packed = x_packed.astype(compute_dtype)
        w_block = w_block.astype(compute_dtype)

    cost = pl.CostEstimate(
        flops=2 * M_pad * K * N,
        transcendentals=2 * P * N,          # sin + cos per output element
        bytes_accessed=int(x_packed.size * x_packed.dtype.itemsize
                           + w_block.size * w_block.dtype.itemsize
                           + (pos_base.size + off_lane.size
                              + freq_lane.size + sel_lane.size) * 4
                           + P * N * 4),
    )

    out = pl.pallas_call(
        functools.partial(data_embedding_kernel, seq_len=L),
        out_shape=jax.ShapeDtypeStruct((P, N), jnp.float32),
        grid_spec=pltpu.PrefetchScalarGridSpec(
            num_scalar_prefetch=0,
            grid=(num_tiles,),
            in_specs=[
                pl.BlockSpec((TILE_P, K), lambda i: (i, 0)),
                pl.BlockSpec((K, N), lambda i: (0, 0)),        # grid-invariant
                pl.BlockSpec((TILE_P, 1), lambda i: (i, 0)),
                pl.BlockSpec((1, N), lambda i: (0, 0)),        # grid-invariant
                pl.BlockSpec((1, N), lambda i: (0, 0)),        # grid-invariant
                pl.BlockSpec((1, N), lambda i: (0, 0)),        # grid-invariant
            ],
            out_specs=pl.BlockSpec((TILE_P, N), lambda i: (i, 0)),
        ),
        compiler_params=pltpu.CompilerParams(
            dimension_semantics=("parallel",),
            vmem_limit_bytes=32 * 1024 * 1024,
        ),
        cost_estimate=cost,
    )(x_packed, w_block, pos_base, off_lane, freq_lane, sel_lane)

    return out.reshape(M_pad, d_model)[:M].reshape(B, L, d_model)


def make_positional_embedding(seq_len, d_model):
    # Mirrors PositionalEmbedding.__init__ (sliced to seq_len) -- used only for the
    # pure-JAX reference check; the kernel regenerates pe internally.
    position = jnp.arange(seq_len, dtype=jnp.float32)[:, None]
    div_term = jnp.exp(
        jnp.arange(0, d_model, 2, dtype=jnp.float32)
        * (-(math.log(10000.0) / d_model))
    )
    angles = position * div_term
    pe = jnp.zeros((seq_len, d_model), dtype=jnp.float32)
    pe = pe.at[:, 0::2].set(jnp.sin(angles))
    pe = pe.at[:, 1::2].set(jnp.cos(angles))
    return pe


def make_token_conv_weight(key, c_in, d_model):
    # Conv1d(c_in, d_model, kernel_size=1, bias=False) weight: (d_model, c_in, 1).
    # kaiming_normal_(mode='fan_in', nonlinearity='leaky_relu', a=0.01 default):
    #   gain = sqrt(2 / (1 + 0.01**2)), fan_in = c_in, std = gain / sqrt(fan_in)
    gain = math.sqrt(2.0 / (1.0 + 0.01 ** 2))
    std = gain / math.sqrt(c_in)
    w = jax.random.normal(key, (d_model, c_in), dtype=jnp.float32) * std
    # Kernel consumes W transposed: (c_in, d_model), so y = x @ W.T == x @ w_t.
    return w.T


if __name__ == "__main__":
    B, L, c_in, d_model = 2, 8, 4, 32

    key = jax.random.PRNGKey(0)
    kx, kw = jax.random.split(key)

    x = jax.random.normal(kx, (B, L, c_in), dtype=jnp.float32)
    w_t = make_token_conv_weight(kw, c_in, d_model)        # (c_in, d_model)

    out = data_embedding(x, w_t)
    jax.block_until_ready(out)

    # Pure-JAX reference of the PyTorch forward.
    pe = make_positional_embedding(L, d_model)             # (L, d_model)
    ref = jnp.einsum("blc,cd->bld", x, w_t) + pe[None, :, :]
    assert out.shape == (B, L, d_model)
    assert jnp.allclose(out, ref, atol=1e-4, rtol=1e-5), float(jnp.max(jnp.abs(out - ref)))

    print("KERNEL_OK")
</pallas_src>

<mosaic_0001>
module attributes {stable_mosaic.version = 11 : i64} {
  func.func @data_embedding_kernel(%arg0: i32, %arg1: memref<8x16xf32, #tpu.memory_space<vmem>>, %arg2: memref<16x128xf32, #tpu.memory_space<vmem>>, %arg3: memref<8x1xf32, #tpu.memory_space<vmem>>, %arg4: memref<1x128xf32, #tpu.memory_space<vmem>>, %arg5: memref<1x128xf32, #tpu.memory_space<vmem>>, %arg6: memref<1x128xf32, #tpu.memory_space<vmem>>, %arg7: memref<8x128xf32, #tpu.memory_space<vmem>>) attributes {dimension_semantics = [#tpu.dimension_semantics<parallel>], iteration_bounds = array<i64: 1>, scalar_prefetch = 0 : i64, scratch_operands = 0 : i64, tpu.core_type = #tpu.core_type<tc>, window_params = [{transform_indices = @transform_0, window_bounds = array<i64: 8, 16>}, {pipeline_mode = #tpu.pipeline_mode<synchronous>, transform_indices = @transform_1, window_bounds = array<i64: 16, 128>}, {transform_indices = @transform_2, window_bounds = array<i64: 8, 1>}, {pipeline_mode = #tpu.pipeline_mode<synchronous>, transform_indices = @transform_3, window_bounds = array<i64: 1, 128>}, {pipeline_mode = #tpu.pipeline_mode<synchronous>, transform_indices = @transform_4, window_bounds = array<i64: 1, 128>}, {pipeline_mode = #tpu.pipeline_mode<synchronous>, transform_indices = @transform_5, window_bounds = array<i64: 1, 128>}, {transform_indices = @transform_6, window_bounds = array<i64: 8, 128>}]} {
    %c0 = arith.constant 0 : index
    %c0_0 = arith.constant 0 : index
    %0 = vector.load %arg1[%c0, %c0_0] : memref<8x16xf32, #tpu.memory_space<vmem>>, vector<8x16xf32>
    %c0_1 = arith.constant 0 : index
    %c0_2 = arith.constant 0 : index
    %1 = vector.load %arg2[%c0_1, %c0_2] : memref<16x128xf32, #tpu.memory_space<vmem>>, vector<16x128xf32>
    %cst = arith.constant dense<0.000000e+00> : vector<8x128xf32>
    %2 = tpu.matmul %0, %1, %cst {dimension_numbers = #tpu.dot_dimension_numbers<[1], [0], [0], [1], [0, 0, 1, 1], [], []>} : vector<8x16xf32>, vector<16x128xf32>, vector<8x128xf32> -> vector<8x128xf32>
    %c0_3 = arith.constant 0 : index
    %c0_4 = arith.constant 0 : index
    %3 = vector.load %arg3[%c0_3, %c0_4] : memref<8x1xf32, #tpu.memory_space<vmem>>, vector<8x1xf32>
    %c0_5 = arith.constant 0 : index
    %c0_6 = arith.constant 0 : index
    %4 = vector.load %arg4[%c0_5, %c0_6] : memref<1x128xf32, #tpu.memory_space<vmem>>, vector<1x128xf32>
    %5 = vector.broadcast %3 : vector<8x1xf32> to vector<8x128xf32>
    %6 = vector.broadcast %4 : vector<1x128xf32> to vector<8x128xf32>
    %7 = arith.addf %5, %6 : vector<8x128xf32>
    %cst_7 = arith.constant 8.000000e+00 : f32
    %8 = vector.broadcast %cst_7 : f32 to vector<8x128xf32>
    %9 = arith.divf %7, %8 : vector<8x128xf32>
    %10 = math.floor %9 : vector<8x128xf32>
    %cst_8 = arith.constant 8.000000e+00 : f32
    %11 = vector.broadcast %cst_8 : f32 to vector<8x128xf32>
    %12 = arith.mulf %11, %10 : vector<8x128xf32>
    %13 = arith.subf %7, %12 : vector<8x128xf32>
    %c0_9 = arith.constant 0 : index
    %c0_10 = arith.constant 0 : index
    %14 = vector.load %arg5[%c0_9, %c0_10] : memref<1x128xf32, #tpu.memory_space<vmem>>, vector<1x128xf32>
    %15 = vector.broadcast %14 : vector<1x128xf32> to vector<8x128xf32>
    %16 = arith.mulf %13, %15 : vector<8x128xf32>
    %c0_11 = arith.constant 0 : index
    %c0_12 = arith.constant 0 : index
    %17 = vector.load %arg6[%c0_11, %c0_12] : memref<1x128xf32, #tpu.memory_space<vmem>>, vector<1x128xf32>
    %cst_13 = arith.constant 0.000000e+00 : f32
    %18 = vector.broadcast %cst_13 : f32 to vector<1x128xf32>
    %19 = arith.cmpf oeq, %17, %18 : vector<1x128xf32>
    %20 = math.sin %16 : vector<8x128xf32>
    %21 = math.cos %16 : vector<8x128xf32>
    %22 = vector.shape_cast %19 : vector<1x128xi1> to vector<1x128xi1>
    %23 = vector.broadcast %22 : vector<1x128xi1> to vector<8x128xi1>
    %24 = arith.select %23, %20, %21 : vector<8x128xi1>, vector<8x128xf32>
    %25 = arith.addf %2, %24 : vector<8x128xf32>
    %c0_14 = arith.constant 0 : index
    %c0_15 = arith.constant 0 : index
    %26 = vector.load %arg7[%c0_14, %c0_15] : memref<8x128xf32, #tpu.memory_space<vmem>>, vector<8x128xf32>
    tpu.vector_store %arg7[%c0_14, %c0_15], %25 {strides = array<i32>} : memref<8x128xf32, #tpu.memory_space<vmem>>, vector<8x128xf32>,
    return
  }
  func.func @transform_0(%arg0: i32) -> (i32, i32) {
    %c0_i32 = arith.constant 0 : i32
    %c0_i32_0 = arith.constant 0 : i32
    return %arg0, %c0_i32 : i32, i32
  }
  func.func @transform_1(%arg0: i32) -> (i32, i32) {
    %c0_i32 = arith.constant 0 : i32
    %c0_i32_0 = arith.constant 0 : i32
    %c0_i32_1 = arith.constant 0 : i32
    return %c0_i32, %c0_i32_0 : i32, i32
  }
  func.func @transform_2(%arg0: i32) -> (i32, i32) {
    %c0_i32 = arith.constant 0 : i32
    %c0_i32_0 = arith.constant 0 : i32
    return %arg0, %c0_i32 : i32, i32
  }
  func.func @transform_3(%arg0: i32) -> (i32, i32) {
    %c0_i32 = arith.constant 0 : i32
    %c0_i32_0 = arith.constant 0 : i32
    %c0_i32_1 = arith.constant 0 : i32
    return %c0_i32, %c0_i32_0 : i32, i32
  }
  func.func @transform_4(%arg0: i32) -> (i32, i32) {
    %c0_i32 = arith.constant 0 : i32
    %c0_i32_0 = arith.constant 0 : i32
    %c0_i32_1 = arith.constant 0 : i32
    return %c0_i32, %c0_i32_0 : i32, i32
  }
  func.func @transform_5(%arg0: i32) -> (i32, i32) {
    %c0_i32 = arith.constant 0 : i32
    %c0_i32_0 = arith.constant 0 : i32
    %c0_i32_1 = arith.constant 0 : i32
    return %c0_i32, %c0_i32_0 : i32, i32
  }
  func.func @transform_6(%arg0: i32) -> (i32, i32) {
    %c0_i32 = arith.constant 0 : i32
    %c0_i32_0 = arith.constant 0 : i32
    return %arg0, %c0_i32 : i32, i32
  }
}

</mosaic_0001>

<bundles_post_ra>
// kernel: tpu_custom_call.1
= control target key start
LH: loop header
LB: loop body
LE: loop exit
PB: predicated region body
PF: predicated region fallthrough
CT: control target
= control target key end

     0   :  { %11 = vsyncpa [#allocation3], 0  ;;  %s631_s0 = inlined_call_operand.vmem [shape: f32[8,16], index: 0, kind: input, shape index: {}]   ;;  %s632_s1 = inlined_call_operand.hbm [shape: f32[16,128], index: 1, kind: input, shape index: {}]   ;;  %s633_s2 = inlined_call_operand.vmem [shape: f32[8,1], index: 2, kind: input, shape index: {}]   ;;  %s634_s3 = inlined_call_operand.vmem [shape: f32[1,128], index: 3, kind: input, shape index: {}]   ;;  %s635_s4 = inlined_call_operand.vmem [shape: f32[1,128], index: 4, kind: input, shape index: {}]   ;;  %s636_s5 = inlined_call_operand.vmem [shape: f32[1,128], index: 5, kind: input, shape index: {}]   ;;  %s637_s6 = inlined_call_operand.hbm [shape: f32[8,128], index: 6, kind: output, shape index: {}]  }
   0x1   :  { %12 = vsyncpa [#allocation4], 0  ;;  %s19_s23 = sshll.u32 %s632_s1, 4  ;;  %s503_s24 = smov [#allocation2]   ;;  %s20_s23 = int_to_ptr.hbm [resolvable:$true] %s19_s23 }
   0x2   :  { %s21_s25 = sshll.u32 %s503_s24, 4  ;;  %s504_s26 = smov 128   ;;  %s22_s25 = int_to_ptr.vmem [resolvable:$true] %s21_s25 }
   0x3   :  { %s505_s27 = smov 8  }
   0x4   :  { %27 = dma.hbm_to_vmem [thread:$0]  %s20_s23, 256, %s22_s25, [#allocation3], %s504_s26, %s504_s26, %s505_s27  }
   0x5   :  { %499 = dma.done.wait [#allocation3], 256  }
   0x6   :  { %500 = vsyncadd [#allocation3], 4294967040  ;;  %v506_v0 = vmov 0   ;;  %v43_v1 = vld [vmem:[%s633_s2] sm:$0xff]  ;;  %v42_v2 = vld [vmem:[#allocation2 + $0x8] sm:$0xff]  ;;  %vm385_vm0 = vcmask 130048  }
   0x7   :  { %446 = vset.pattern.permute.xlu0 %v506_v0  ;;  %v41_v3 = vld [vmem:[#allocation2] sm:$0xff]  ;;  %403 = vmatpush.msra.mxu0 %v42_v2  ;;  %v507_v5 = vmov 8.0   ;;  %v508_v32 = vmov 2102212464   ;;  %v509_v34 = vmov 920167782  }
   0x8   :  { %47 = vperm.xlu0 %446, %v43_v1   ;;  %v40_v4 = vld [vmem:[%s631_s0] sm:$0xff]  ;;  %449 = vrcp.f32 %v507_v5  ;;  %v510_v37 = vmov 1326507024   ;;  %v511_v39 = vmov 683565275   ;;  %s417_s12 = sshll.u32 %s637_s6, 4  ;;  %s418_s12 = int_to_ptr.hbm [resolvable:$true] %s417_s12 }
   0x9   :  { %404 = vmatpush.msra.mxu0 %v41_v3  ;;  %v447_v11 = vld [vmem:[%s634_s3] ss:$0 sm:$0xff]  ;;  %v512_v41 = vmov 2475754826   ;;  %v513_v44 = vmov 2131351028  }
   0xa   :  { %433 = vmatmul.msk.f32.vlgmr.msra.gmra.mxu0 %vm385_vm0, %v40_v4  ;;  %v448_v17 = vld [vmem:[%s635_s4] ss:$0 sm:$0xff] }
   0xe   :  { %v450_v6 = vpop.eup %449 }
   0xf   :  { %v55_v7 = vmul.f32 8.0, %v450_v6  ;;  %vm59_vm1 = vweird.f32 %v450_v6 }
  0x11   :  { %v56_v8 = vsub.f32 1.0, %v55_v7 }
  0x13   :  { %v57_v9 = vmul.f32 %v450_v6, %v56_v8 }
  0x15   :  { %v58_v10 = vadd.f32 %v450_v6, %v57_v9 }
  0x17   :  { %v60_v12 = vsel %vm59_vm1, %v450_v6, %v58_v10 }
  0x7a   :  { %v48_v13 = vpop.permute.xlu0 %47 }
  0x7b   :  { %v53_v14 = vadd.f32 %v447_v11, %v48_v13 }
  0x7d   :  { %v61_v15 = vmul.f32 %v60_v12, %v53_v14 }
  0x7f   :  { %v62_v16 = vfloor.f32 %v61_v15 }
  0x81   :  { %v63_v18 = vmul.f32 8.0, %v62_v16 }
  0x83   :  { %v64_v19 = vsub.f32 %v53_v14, %v63_v18 }
  0x85   :  { %v566_v20 = vmul.f32 %v448_v17, %v64_v19 }
  0x87   :  { %v75_v21 = vand.u32 2139095040, %v566_v20  ;;  %v72_v24 = vand.u32 2147483647, %v566_v20  ;;  %vm74_vm14 = vcmp.lt.s32.totalorder %v566_v20, 0 }
  0x89   :  { %v76_v22 = vshrl.u32 %v75_v21, 23  ;;  %v79_v26 = vand.u32 8388607, %v72_v24  ;;  %vm73_vm15 = vcmp.le.f32.partialorder %v72_v24, 0.7853982 }
  0x8b   :  { %v427_v23 = vadd.s32 4294967169, %v76_v22  ;;  %v80_v30 = vor.u32 8388608, %v79_v26 }
  0x8d   :  { %v82_v25 = vadd.s32 1, %v427_v23  ;;  %v581_v51 = vshll.u32 %v80_v30, 8 }
  0x8f   :  { %vm83_vm2 = vcmp.gt.s32.totalorder %v82_v25, 0  ;;  %v121_v61 = vand.u32 65535, %v581_v51  ;;  %v122_v63 = vshrl.u32 %v581_v51, 16 }
  0x90   :  { %v84_v27 = vsel %vm83_vm2, %v82_v25, 0 }
  0x91   :  { %v86_v28 = vand.u32 31, %v84_v27  ;;  %v574_v31 = vshrl.u32 %v84_v27, 5 }
  0x93   :  { %v572_v29 = vsub.s32 32, %v86_v28  ;;  %v98_v33 = vshll.u32 %v508_v32, %v86_v28  ;;  %v101_v35 = vshll.u32 %v509_v34, %v86_v28  ;;  %v89_v40 = vshll.u32 %v511_v39, %v86_v28 }
  0x94   :  { %v92_v43 = vshll.u32 %v512_v41, %v86_v28  ;;  %v95_v46 = vshll.u32 %v513_v44, %v86_v28  ;;  %vm107_vm3 = vcmp.lt.s32.totalorder %v574_v31, 4  ;;  %vm104_vm4 = vcmp.lt.s32.totalorder %v574_v31, 1 }
  0x95   :  { %v99_v36 = vshrl.u32 %v509_v34, %v572_v29  ;;  %v102_v38 = vshrl.u32 %v510_v37, %v572_v29  ;;  %v90_v42 = vshrl.u32 %v512_v41, %v572_v29  ;;  %v93_v45 = vshrl.u32 %v513_v44, %v572_v29 }
  0x96   :  { %v96_v47 = vshrl.u32 %v508_v32, %v572_v29  ;;  %vm106_vm5 = vcmp.lt.s32.totalorder %v574_v31, 3  ;;  %vm105_vm6 = vcmp.lt.s32.totalorder %v574_v31, 2  ;;  %v88_v25 = vshrl.u32 %v511_v39, %v572_v29 }
  0x97   :  { %v100_v48 = vor.u32 %v99_v36, %v98_v33  ;;  %v103_v49 = vor.u32 %v102_v38, %v101_v35  ;;  %v91_v50 = vor.u32 %v90_v42, %v89_v40  ;;  %v94_v52 = vor.u32 %v93_v45, %v92_v43 }
  0x98   :  { %v97_v53 = vor.u32 %v96_v47, %v95_v46 }
  0x99   :  { %v113_v54 = vsel %vm107_vm3, %v100_v48, 920167782  ;;  %v117_v55 = vsel %vm107_vm3, %v103_v49, 1326507024  ;;  %v112_v56 = vsel %vm104_vm4, %v91_v50, %v94_v52  ;;  %v108_v33 = vsel %vm104_vm4, %v88_v25, %v91_v50 }
  0x9a   :  { %v114_v57 = vsel %vm106_vm5, %v97_v53, %v113_v54  ;;  %v116_v58 = vsel %vm104_vm4, %v94_v52, %v97_v53  ;;  %v118_v60 = vsel %vm106_vm5, %v100_v48, %v117_v55  ;;  %v109_v21 = vsel %vm107_vm3, %v97_v53, 2102212464 }
  0x9b   :  { %v115_v59 = vsel %vm105_vm6, %v112_v56, %v114_v57  ;;  %v119_v62 = vsel %vm105_vm6, %v116_v58, %v118_v60  ;;  %v110_v34 = vsel %vm106_vm5, %v94_v52, %v109_v21 }
  0x9c   :  { %v145_v1 = vand.u32 65535, %v115_v59  ;;  %v146_v2 = vshrl.u32 %v115_v59, 16  ;;  %v123_v3 = vand.u32 65535, %v119_v62  ;;  %v124_v4 = vshrl.u32 %v119_v62, 16 }
  0x9d   :  { %v111_v39 = vsel %vm105_vm6, %v108_v33, %v110_v34 }
  0x9e   :  { %v148_v5 = vmul.u32 %v146_v2, %v121_v61  ;;  %v149_v6 = vmul.u32 %v145_v1, %v122_v63  ;;  %v126_v7 = vmul.u32 %v124_v4, %v121_v61  ;;  %v127_v8 = vmul.u32 %v123_v3, %v122_v63 }
  0x9f   :  { %v147_v9 = vmul.u32 %v145_v1, %v121_v61  ;;  %v125_v11 = vmul.u32 %v123_v3, %v121_v61  ;;  %v150_v13 = vmul.u32 %v146_v2, %v122_v63  ;;  %v128_v14 = vmul.u32 %v124_v4, %v122_v63 }
  0xa0   :  { %v151_v10 = vshll.u32 %v148_v5, 16  ;;  %v129_v12 = vshll.u32 %v126_v7, 16  ;;  %v153_v15 = vshll.u32 %v149_v6, 16  ;;  %v131_v17 = vshll.u32 %v127_v8, 16 }
  0xa1   :  { %v152_v30 = vshrl.u32 %v148_v5, 16  ;;  %v130_v35 = vshrl.u32 %v126_v7, 16  ;;  %v154_v37 = vshrl.u32 %v149_v6, 16  ;;  %v132_v40 = vshrl.u32 %v127_v8, 16 }
  0xa2   :  { %vm155_vm7 = vc.u32 %v147_v9, %v151_v10  ;;  %v157_v16 = vadd.s32 %v151_v10, %v147_v9  ;;  %vm133_vm8 = vc.u32 %v125_v11, %v129_v12  ;;  %v135_v18 = vadd.s32 %v129_v12, %v125_v11 }
  0xa3   :  { %v156_v19 = vsel %vm155_vm7, 1, %v506_v0  ;;  %v134_v22 = vsel %vm133_vm8, 1, %v506_v0  ;;  %v165_v45 = vmul.u32 %v581_v51, %v111_v39  ;;  %vm215_vm8 = vweird.f32 %v566_v20  ;;  %v406_v39 = vpop.f32.mrf.mxu0 }
  0xa4   :  { %v158_v23 = vadd.s32 %v156_v19, %v150_v13  ;;  %vm159_vm9 = vc.u32 %v157_v16, %v153_v15  ;;  %v136_v26 = vadd.s32 %v134_v22, %v128_v14  ;;  %vm137_vm10 = vc.u32 %v135_v18, %v131_v17  ;;  %v70_v13 = vld [vmem:[%s636_s5] sm:$0x1]  ;;  %s514_s5 = smov [#allocation5]  }
  0xa5   :  { %v160_v27 = vsel %vm159_vm9, 1, %v506_v0  ;;  %v138_v28 = vsel %vm137_vm10, 1, %v506_v0  ;;  %v161_v43 = vadd.s32 %v157_v16, %v153_v15  ;;  %vm71_vm0 = vcmp.eq.f32.partialorder %v70_v13, 0.0  ;;  %s415_s9 = sshll.u32 %s514_s5, 4  ;;  %s416_s9 = int_to_ptr.vmem [resolvable:$true] %s415_s9 }
  0xa6   :  { %v162_v32 = vadd.s32 %v160_v27, %v158_v23  ;;  %v140_v36 = vadd.s32 %v138_v28, %v136_v26  ;;  %v381_v25 = vsel %vm71_vm0, 1, %v506_v0 }
  0xa8   :  { %v163_v38 = vadd.s32 %v162_v32, %v152_v30  ;;  %v141_v29 = vadd.s32 %v140_v36, %v130_v35  ;;  %v382_v32 = vperm.slane %v381_v25, 0 }
  0xaa   :  { %v164_v41 = vadd.s32 %v163_v38, %v154_v37  ;;  %v142_v42 = vadd.s32 %v141_v29, %v132_v40  ;;  %vm383_vm7 = vcmp.eq.s32.totalorder %v382_v32, 1 }
  0xac   :  { %v168_v44 = vadd.s32 1, %v164_v41  ;;  %vm167_vm11 = vc.u32 %v142_v42, %v161_v43  ;;  %v166_v57 = vadd.s32 %v161_v43, %v142_v42 }
  0xae   :  { %v169_v46 = vsel %vm167_vm11, %v168_v44, %v164_v41 }
  0xaf   :  { %v170_v47 = vadd.s32 %v169_v46, %v165_v45 }
  0xb1   :  { %v171_v48 = vadd.s32 536870912, %v170_v47 }
  0xb3   :  { %v172_v49 = vshrl.u32 %v171_v48, 30 }
  0xb5   :  { %v173_v50 = vshll.u32 %v172_v49, 30  ;;  %v196_v7 = vsub.s32 4, %v172_v49 }
  0xb7   :  { %v174_v52 = vsub.s32 %v170_v47, %v173_v50  ;;  %v197_v12 = vsel %vm74_vm14, %v196_v7, %v172_v49 }
  0xb8   :  { %v199_v16 = vsel %vm73_vm15, 0, %v197_v12 }
  0xb9   :  { %vm175_vm12 = vcmp.lt.s32.totalorder %v174_v52, 0  ;;  %v176_v53 = vsub.s32 0, %v174_v52  ;;  %v216_v21 = vadd.s32 3, %v199_v16  ;;  %v371_v28 = vand.u32 3, %v199_v16 }
  0xbb   :  { %v177_v54 = vsel %vm175_vm12, %v176_v53, %v174_v52  ;;  %v217_v30 = vand.u32 3, %v216_v21  ;;  %vm372_vm1 = vcmp.lt.s32.totalorder %v371_v28, 2  ;;  %vm373_vm2 = vcmp.eq.s32.totalorder %v371_v28, 0 }
  0xbc   :  { %v178_v55 = vclz %v177_v54  ;;  %vm376_vm3 = vcmp.eq.s32.totalorder %v371_v28, 2 }
  0xbd   :  { %vm218_vm4 = vcmp.lt.s32.totalorder %v217_v30, 2  ;;  %vm219_vm5 = vcmp.eq.s32.totalorder %v217_v30, 0  ;;  %vm222_vm6 = vcmp.eq.s32.totalorder %v217_v30, 2 }
  0xbe   :  { %v428_v56 = vadd.s32 4294967294, %v178_v55 }
  0xc0   :  { %vm429_vm13 = vcmp.lt.s32.totalorder %v428_v56, 0 }
  0xc1   :  { %v181_v31 = vsel %vm429_vm13, 0, %v428_v56 }
  0xc2   :  { %v182_v58 = vsub.s32 32, %v181_v31  ;;  %v186_v59 = vsub.s32 4294967266, %v181_v31  ;;  %v183_v60 = vshll.u32 %v174_v52, %v181_v31 }
  0xc4   :  { %v184_v61 = vshrl.u32 %v166_v57, %v182_v58  ;;  %v187_v51 = vadd.s32 127, %v186_v59 }
  0xc6   :  { %v185_v62 = vor.u32 %v184_v61, %v183_v60  ;;  %v188_v63 = vshll.u32 %v187_v51, 23 }
  0xc8   :  { %v189_v1 = vor.u32 4788187, %v188_v63  ;;  %v192_v3 = vcvt.s32.f32 %v185_v62 }
  0xca   :  { %v190_v2 = vand.u32 2147483647, %v189_v1 }
  0xcc   :  { %v193_v4 = vmul.f32 %v192_v3, %v190_v2 }
  0xce   :  { %v194_v5 = vxor.u32 2147483648, %v193_v4 }
  0xd0   :  { %v195_v6 = vsel %vm74_vm14, %v194_v5, %v193_v4 }
  0xd1   :  { %v198_v8 = vsel %vm73_vm15, %v566_v20, %v195_v6 }
  0xd2   :  { %v200_v9 = vmul.f32 %v198_v8, %v198_v8 }
  0xd4   :  { %v201_v10 = vmul.f32 -0.001358992, %v200_v9  ;;  %v208_v11 = vmul.f32 -0.00019511016, %v200_v9 }
  0xd6   :  { %v202_v14 = vadd.f32 0.041655596, %v201_v10  ;;  %v209_v15 = vadd.f32 0.008332121, %v208_v11 }
  0xd8   :  { %v203_v17 = vmul.f32 %v202_v14, %v200_v9  ;;  %v210_v18 = vmul.f32 %v209_v15, %v200_v9 }
  0xda   :  { %v204_v19 = vadd.f32 -0.4999988, %v203_v17  ;;  %v211_v24 = vadd.f32 -0.16666654, %v210_v18 }
  0xdc   :  { %v205_v22 = vmul.f32 %v204_v19, %v200_v9  ;;  %v212_v23 = vmul.f32 %v211_v24, %v200_v9 }
  0xde   :  { %v206_v26 = vadd.f32 1.0, %v205_v22  ;;  %v213_v27 = vadd.f32 1.0, %v212_v23 }
  0xe0   :  { %v214_v33 = vmul.f32 %v213_v27, %v198_v8  ;;  %v223_v34 = vxor.u32 2147483648, %v206_v26 }
  0xe2   :  { %v220_v35 = vxor.u32 2147483648, %v214_v33  ;;  %v224_v37 = vsel %vm222_vm6, %v223_v34, %v214_v33  ;;  %v378_v40 = vsel %vm376_vm3, %v223_v34, %v214_v33 }
  0xe4   :  { %v221_v36 = vsel %vm219_vm5, %v206_v26, %v220_v35  ;;  %v375_v38 = vsel %vm373_vm2, %v206_v26, %v220_v35 }
  0xe5   :  { %v225_v0 = vsel %vm218_vm4, %v221_v36, %v224_v37  ;;  %v379_v29 = vsel %vm372_vm1, %v375_v38, %v378_v40 }
  0xe6   :  { %v226_v41 = vsel %vm215_vm8, nan, %v225_v0  ;;  %v380_v42 = vsel %vm215_vm8, nan, %v379_v29 }
  0xe7   :  { %v384_v43 = vsel %vm383_vm7, %v226_v41, %v380_v42 }
  0xe8   :  { %v407_v44 = vadd.f32 %v406_v39, %v384_v43 }
  0xea   :  { %409 = vst [vmem:[#allocation5] sm:$0xff] %v407_v44 }
  0xeb   :  { %420 = dma.vmem_to_hbm [thread:$0]  %s416_s9, 128, %s418_s12, [#allocation4]  }
  0xec   :  { %501 = dma.done.wait [#allocation4], 128  }
  0xed   :  { %502 = vsyncadd [#allocation4], 4294967168 }
  0xee   :  { %425 = vsyncpa [#allocation3], 1 }
  0xef   :  { %426 = vsyncpa [#allocation4], 1 }

</bundles_post_ra>
